<compile_context>
chip_gen: v6e
topology: v6e:2x2x1
jax: 0.10.0
libtpu: 0.0.40
codegen_flags: <defaults>
</compile_context>

<pallas_src>
import functools

import jax
import jax.numpy as jnp
from jax.experimental import pallas as pl
from jax.experimental.pallas import tpu as pltpu


def _round_up(x, m):
    return (x + m - 1) // m * m


def _vmem_capacity_bytes():
    """Real per-core VMEM capacity; conservative 64 MiB fallback (v7x)."""
    try:
        info = pltpu.get_tpu_info()
        for attr in ("vmem_capacity_bytes", "vmem_bytes", "vmem_size_bytes"):
            v = getattr(info, attr, None)
            if v:
                return int(v)
    except Exception:
        pass
    return 64 * 1024 * 1024


# --------------------------------------------------------------------------
# Kernels
# --------------------------------------------------------------------------
def _make_fused_kernel(n_seg):
    """Fused concat+linear: one dot per (128-aligned) segment, f32 accum."""

    def kernel(*refs):
        x_refs = refs[:n_seg]                  # each [tm, d_i_p]
        w_refs = refs[n_seg:2 * n_seg]         # each [d_i_p, tn]  (D_in-major)
        b_ref = refs[2 * n_seg]                # [1, tn]
        o_ref = refs[2 * n_seg + 1]            # [tm, tn]

        acc = jnp.dot(x_refs[0][...], w_refs[0][...],
                      preferred_element_type=jnp.float32)
        for s in range(1, n_seg):
            acc = acc + jnp.dot(x_refs[s][...], w_refs[s][...],
                                preferred_element_type=jnp.float32)
        o_ref[...] = (acc + b_ref[...].astype(jnp.float32)).astype(o_ref.dtype)

    return kernel


def _ktiled_kernel(x_ref, w_ref, b_ref, o_ref, acc_ref):
    """K-tiled linear for huge D_in: VMEM f32 accumulator across k."""
    @pl.when(pl.program_id(2) == 0)
    def _():
        acc_ref[...] = jnp.zeros_like(acc_ref)

    acc_ref[...] += jnp.dot(x_ref[...], w_ref[...],
                            preferred_element_type=jnp.float32)

    @pl.when(pl.program_id(2) == pl.num_programs(2) - 1)
    def _():
        o_ref[...] = (acc_ref[...] + b_ref[...].astype(jnp.float32)
                      ).astype(o_ref.dtype)


# --------------------------------------------------------------------------
# One-time parameter repack (outside the hot path)
# --------------------------------------------------------------------------
def prepare_controller_params(params, seg_dims, activation_dtype=None,
                              force_mode=None, tk=512):
    """Transpose W -> [D_in, D_out], pad lanes, split per segment (or pad to
    K-tiles for the large-D_in fallback).  Call once; reuse across steps."""
    w = jnp.asarray(params["weight"])          # [D_out, D_in]
    b = jnp.asarray(params["bias"])            # [D_out]
    d_out, d_in = int(w.shape[0]), int(w.shape[1])
    seg_dims = tuple(int(d) for d in seg_dims)
    assert sum(seg_dims) == d_in

    dts = [w.dtype, b.dtype]
    if activation_dtype is not None:
        dts.append(jnp.dtype(activation_dtype))
    cdtype = jnp.result_type(*dts)
    itemsize = jnp.dtype(cdtype).itemsize

    d_out_p = 128 if d_out <= 128 else _round_up(d_out, 256)
    seg_dims_p = tuple(_round_up(d, 128) for d in seg_dims)
    d_in_p = sum(seg_dims_p)

    w_t = jnp.transpose(w).astype(cdtype)      # [D_in, D_out] -- one time
    b_p = b.astype(cdtype).reshape(1, d_out)
    if d_out_p != d_out:
        w_t = jnp.pad(w_t, ((0, 0), (0, d_out_p - d_out)))
        b_p = jnp.pad(b_p, ((0, 0), (0, d_out_p - d_out)))

    # Decide fused vs K-tiled from a conservative per-step VMEM estimate
    # (tm=256 activations + tn=128 weight, double buffered, + f32 acc).
    cap = _vmem_capacity_bytes()
    budget = int(cap * 0.75)
    worst = 2 * (256 + 128) * d_in_p * itemsize + 256 * 128 * 4
    mode = "ktiled" if worst > budget else "fused"
    if force_mode is not None:
        mode = force_mode

    prepared = dict(mode=mode, cdtype=cdtype, seg_dims=seg_dims,
                    seg_dims_p=seg_dims_p, d_in=d_in, d_out=d_out,
                    d_out_p=d_out_p, bias=b_p)

    if mode == "fused":
        w_segs, off = [], 0
        for d, dp in zip(seg_dims, seg_dims_p):
            ws = w_t[off:off + d]
            if dp != d:
                ws = jnp.pad(ws, ((0, dp - d), (0, 0)))   # zero rows: no-op math
            w_segs.append(ws)
            off += d
        prepared["w_segs"] = tuple(w_segs)
    else:
        tk = int(tk)
        d_in_kp = _round_up(d_in, tk)
        if d_in_kp != d_in:
            w_t = jnp.pad(w_t, ((0, d_in_kp - d_in), (0, 0)))
        prepared["w_full"] = w_t
        prepared["tk"] = tk
        prepared["d_in_kp"] = d_in_kp
    return prepared


# --------------------------------------------------------------------------
# Forward
# --------------------------------------------------------------------------
def controller_forward(prepared, *xs):
    """Equivalent of Controller.forward(*xs): cat(xs, dim=1) -> Linear."""
    seg_dims = prepared["seg_dims"]
    assert len(xs) == len(seg_dims)
    assert all(x.ndim == 2 for x in xs)
    cdtype = prepared["cdtype"]
    itemsize = jnp.dtype(cdtype).itemsize
    d_in, d_out, d_out_p = prepared["d_in"], prepared["d_out"], prepared["d_out_p"]
    batch = int(xs[0].shape[0])

    # Batch tiling: fill the MXU M dim (pad zero rows, sliced off afterwards);
    # sublane-pack aware for narrow dtypes (f32->8, bf16->16, int8/fp8->32).
    sub_m = 8 * max(1, 4 // itemsize)
    tm = 256 if batch > 256 else _round_up(max(batch, 1), sub_m)
    batch_p = _round_up(batch, tm)

    cap = _vmem_capacity_bytes()
    budget = int(cap * 0.75)
    b_p = prepared["bias"]
    tn_candidates = [c for c in (512, 256, 128) if d_out_p % c == 0]

    if prepared["mode"] == "fused":
        seg_dims_p = prepared["seg_dims_p"]
        d_in_p = sum(seg_dims_p)

        def step_bytes(tn_):
            return ((2 * tm * d_in_p + 2 * d_in_p * tn_ + 2 * tn_
                     + 2 * tm * tn_) * itemsize + tm * tn_ * 4)

        tn = tn_candidates[-1]
        for c in tn_candidates:                 # largest tn that fits VMEM
            if step_bytes(c) <= budget:
                tn = c
                break

        xs_p = [jnp.pad(x.astype(cdtype), ((0, batch_p - batch), (0, dp - d)))
                for x, d, dp in zip(xs, seg_dims, seg_dims_p)]

        # j (d_out tiles) outer + parallel: weight tiles megacore-sharded and
        # VMEM-resident across the inner batch axis.
        grid = (d_out_p // tn, batch_p // tm)
        in_specs = ([pl.BlockSpec((tm, dp), lambda j, i: (i, 0))
                     for dp in seg_dims_p]
                    + [pl.BlockSpec((dp, tn), lambda j, i: (0, j))
                       for dp in seg_dims_p]
                    + [pl.BlockSpec((1, tn), lambda j, i: (0, j))])
        out_spec = pl.BlockSpec((tm, tn), lambda j, i: (i, j))
        kernel = _make_fused_kernel(len(seg_dims))
        operands = tuple(xs_p) + prepared["w_segs"] + (b_p,)
        scratch = []
        dims = ("parallel", "parallel")
        bytes_accessed = (d_in_p * d_out_p * itemsize
                          + batch_p * d_in_p * itemsize * (d_out_p // tn)
                          + batch_p * d_out_p * itemsize
                          + d_out_p * itemsize)
        vmem_limit = int(min(cap, max(4 * step_bytes(tn), 32 * 1024 * 1024)))
    else:
        tk, d_in_kp = prepared["tk"], prepared["d_in_kp"]

        def step_bytes(tn_):
            return ((2 * tm * tk + 2 * tk * tn_ + 2 * tn_
                     + 2 * tm * tn_) * itemsize + tm * tn_ * 4)

        tn = tn_candidates[-1]
        for c in tn_candidates:
            if step_bytes(c) <= budget:
                tn = c
                break

        # Large-D_in fallback: concat once, stream K tiles through a f32
        # accumulator (keeps tn large within v7x's 64 MiB VMEM).
        cat = jnp.concatenate([x.astype(cdtype) for x in xs], axis=1)
        cat = jnp.pad(cat, ((0, batch_p - batch), (0, d_in_kp - d_in)))

        grid = (d_out_p // tn, batch_p // tm, d_in_kp // tk)
        in_specs = [pl.BlockSpec((tm, tk), lambda j, i, k: (i, k)),
                    pl.BlockSpec((tk, tn), lambda j, i, k: (k, j)),
                    pl.BlockSpec((1, tn), lambda j, i, k: (0, j))]
        out_spec = pl.BlockSpec((tm, tn), lambda j, i, k: (i, j))
        kernel = _ktiled_kernel
        operands = (cat, prepared["w_full"], b_p)
        scratch = [pltpu.VMEM((tm, tn), jnp.float32)]
        dims = ("parallel", "parallel", "arbitrary")
        bytes_accessed = (d_in_kp * d_out_p * itemsize
                          + batch_p * d_in_kp * itemsize * (d_out_p // tn)
                          + batch_p * d_out_p * itemsize
                          + d_out_p * itemsize)
        vmem_limit = int(min(cap, max(4 * step_bytes(tn), 32 * 1024 * 1024)))

    cost = pl.CostEstimate(flops=int(2 * batch * d_in * d_out),
                           transcendentals=0,
                           bytes_accessed=int(bytes_accessed))

    out_p = pl.pallas_call(
        kernel,
        out_shape=jax.ShapeDtypeStruct((batch_p, d_out_p), cdtype),
        grid=grid,
        in_specs=in_specs,
        out_specs=out_spec,
        scratch_shapes=scratch,
        compiler_params=pltpu.CompilerParams(
            dimension_semantics=dims,
            vmem_limit_bytes=vmem_limit),
        cost_estimate=cost,
    )(*operands)

    return out_p[:batch, :d_out]


def init_controller_params(key, input_size, output_size, dtype=jnp.float32):
    """Deterministic init matching nn.Linear shapes (Kaiming-uniform-like)."""
    kw, kb = jax.random.split(key)
    bound = 1.0 / (input_size ** 0.5)
    weight = jax.random.uniform(
        kw, (output_size, input_size), dtype, minval=-bound, maxval=bound)
    bias = jax.random.uniform(
        kb, (output_size,), dtype, minval=-bound, maxval=bound)
    return {"weight": weight, "bias": bias}


if __name__ == "__main__":
    key = jax.random.PRNGKey(0)
    k1, k2, k3, k4, kp1, kp2 = jax.random.split(key, 6)

    # ---- test 1: fused-concat path (default) --------------------------------
    # Two inputs concatenated along dim=1: [2,16] ++ [2,16] -> [2,32] -> [2,8]
    batch = 2
    x1 = jax.random.normal(k1, (batch, 16), jnp.float32)
    x2 = jax.random.normal(k2, (batch, 16), jnp.float32)
    params = init_controller_params(kp1, 32, 8)
    prepared = prepare_controller_params(params, (16, 16),
                                         activation_dtype=x1.dtype,
                                         force_mode="fused")
    fwd = jax.jit(functools.partial(controller_forward, prepared))
    out = fwd(x1, x2)
    jax.block_until_ready(out)
    ref = jnp.concatenate([x1, x2], axis=1) @ params["weight"].T + params["bias"]
    assert out.shape == (batch, 8)
    assert jnp.allclose(out, ref, atol=1e-4, rtol=1e-4)

    # ---- test 2: K-tiled fallback path (forced, small shapes) ---------------
    batch2 = 16
    y1 = jax.random.normal(k3, (batch2, 64), jnp.float32)
    y2 = jax.random.normal(k4, (batch2, 192), jnp.float32)
    params2 = init_controller_params(kp2, 256, 200)
    prepared2 = prepare_controller_params(params2, (64, 192),
                                          activation_dtype=y1.dtype,
                                          force_mode="ktiled", tk=128)
    fwd2 = jax.jit(functools.partial(controller_forward, prepared2))
    out2 = fwd2(y1, y2)
    jax.block_until_ready(out2)
    ref2 = jnp.concatenate([y1, y2], axis=1) @ params2["weight"].T + params2["bias"]
    assert out2.shape == (batch2, 200)
    assert jnp.allclose(out2, ref2, atol=1e-4, rtol=1e-4)

    print("KERNEL_OK")
</pallas_src>

<mosaic_0001>
module attributes {stable_mosaic.version = 11 : i64} {
  func.func @kernel(%arg0: i32, %arg1: i32, %arg2: memref<8x128xf32, #tpu.memory_space<vmem>>, %arg3: memref<8x128xf32, #tpu.memory_space<vmem>>, %arg4: memref<128x128xf32, #tpu.memory_space<vmem>>, %arg5: memref<128x128xf32, #tpu.memory_space<vmem>>, %arg6: memref<1x128xf32, #tpu.memory_space<vmem>>, %arg7: memref<8x128xf32, #tpu.memory_space<vmem>>) attributes {dimension_semantics = [#tpu.dimension_semantics<parallel>, #tpu.dimension_semantics<parallel>], iteration_bounds = array<i64: 1, 1>, scalar_prefetch = 0 : i64, scratch_operands = 0 : i64, tpu.core_type = #tpu.core_type<tc>, window_params = [{transform_indices = @transform_0, window_bounds = array<i64: 8, 128>}, {transform_indices = @transform_1, window_bounds = array<i64: 8, 128>}, {transform_indices = @transform_2, window_bounds = array<i64: 128, 128>}, {transform_indices = @transform_3, window_bounds = array<i64: 128, 128>}, {transform_indices = @transform_4, window_bounds = array<i64: 1, 128>}, {transform_indices = @transform_5, window_bounds = array<i64: 8, 128>}]} {
    %c0 = arith.constant 0 : index
    %c0_0 = arith.constant 0 : index
    %0 = vector.load %arg2[%c0, %c0_0] : memref<8x128xf32, #tpu.memory_space<vmem>>, vector<8x128xf32>
    %c0_1 = arith.constant 0 : index
    %c0_2 = arith.constant 0 : index
    %1 = vector.load %arg4[%c0_1, %c0_2] : memref<128x128xf32, #tpu.memory_space<vmem>>, vector<128x128xf32>
    %cst = arith.constant dense<0.000000e+00> : vector<8x128xf32>
    %2 = tpu.matmul %0, %1, %cst {dimension_numbers = #tpu.dot_dimension_numbers<[1], [0], [0], [1], [0, 0, 1, 1], [], []>} : vector<8x128xf32>, vector<128x128xf32>, vector<8x128xf32> -> vector<8x128xf32>
    %c0_3 = arith.constant 0 : index
    %c0_4 = arith.constant 0 : index
    %3 = vector.load %arg3[%c0_3, %c0_4] : memref<8x128xf32, #tpu.memory_space<vmem>>, vector<8x128xf32>
    %c0_5 = arith.constant 0 : index
    %c0_6 = arith.constant 0 : index
    %4 = vector.load %arg5[%c0_5, %c0_6] : memref<128x128xf32, #tpu.memory_space<vmem>>, vector<128x128xf32>
    %cst_7 = arith.constant dense<0.000000e+00> : vector<8x128xf32>
    %5 = tpu.matmul %3, %4, %cst_7 {dimension_numbers = #tpu.dot_dimension_numbers<[1], [0], [0], [1], [0, 0, 1, 1], [], []>} : vector<8x128xf32>, vector<128x128xf32>, vector<8x128xf32> -> vector<8x128xf32>
    %6 = arith.addf %2, %5 : vector<8x128xf32>
    %c0_8 = arith.constant 0 : index
    %c0_9 = arith.constant 0 : index
    %7 = vector.load %arg6[%c0_8, %c0_9] : memref<1x128xf32, #tpu.memory_space<vmem>>, vector<1x128xf32>
    %8 = vector.broadcast %7 : vector<1x128xf32> to vector<8x128xf32>
    %9 = arith.addf %6, %8 : vector<8x128xf32>
    %c0_10 = arith.constant 0 : index
    %c0_11 = arith.constant 0 : index
    %10 = vector.load %arg7[%c0_10, %c0_11] : memref<8x128xf32, #tpu.memory_space<vmem>>, vector<8x128xf32>
    tpu.vector_store %arg7[%c0_10, %c0_11], %9 {strides = array<i32>} : memref<8x128xf32, #tpu.memory_space<vmem>>, vector<8x128xf32>,
    return
  }
  func.func @transform_0(%arg0: i32, %arg1: i32) -> (i32, i32) {
    %c0_i32 = arith.constant 0 : i32
    %c0_i32_0 = arith.constant 0 : i32
    return %arg1, %c0_i32 : i32, i32
  }
  func.func @transform_1(%arg0: i32, %arg1: i32) -> (i32, i32) {
    %c0_i32 = arith.constant 0 : i32
    %c0_i32_0 = arith.constant 0 : i32
    return %arg1, %c0_i32 : i32, i32
  }
  func.func @transform_2(%arg0: i32, %arg1: i32) -> (i32, i32) {
    %c0_i32 = arith.constant 0 : i32
    %c0_i32_0 = arith.constant 0 : i32
    return %c0_i32, %arg0 : i32, i32
  }
  func.func @transform_3(%arg0: i32, %arg1: i32) -> (i32, i32) {
    %c0_i32 = arith.constant 0 : i32
    %c0_i32_0 = arith.constant 0 : i32
    return %c0_i32, %arg0 : i32, i32
  }
  func.func @transform_4(%arg0: i32, %arg1: i32) -> (i32, i32) {
    %c0_i32 = arith.constant 0 : i32
    %c0_i32_0 = arith.constant 0 : i32
    return %c0_i32, %arg0 : i32, i32
  }
  func.func @transform_5(%arg0: i32, %arg1: i32) -> (i32, i32) {
    %c0_i32 = arith.constant 0 : i32
    return %arg1, %arg0 : i32, i32
  }
}

</mosaic_0001>

<bundles_post_ra>
// kernel: controller_forward.1
= control target key start
LH: loop header
LB: loop body
LE: loop exit
PB: predicated region body
PF: predicated region fallthrough
CT: control target
= control target key end

     0   :  { %10 = vsyncpa [#allocation3], 0  ;;  %s480_s0 = inlined_call_operand.vmem [shape: f32[8,128], index: 0, kind: input, shape index: {}]   ;;  %s481_s1 = inlined_call_operand.vmem [shape: f32[8,128], index: 1, kind: input, shape index: {}]   ;;  %s482_s2 = inlined_call_operand.hbm [shape: f32[128,128], index: 2, kind: input, shape index: {}]   ;;  %s483_s3 = inlined_call_operand.hbm [shape: f32[128,128], index: 3, kind: input, shape index: {}]   ;;  %s484_s4 = inlined_call_operand.vmem [shape: f32[1,128], index: 4, kind: input, shape index: {}]   ;;  %s485_s5 = inlined_call_operand.vmem [shape: f32[8,128], index: 5, kind: output, shape index: {}]  }
   0x1   :  { %11 = vsyncpa [#allocation5], 0  ;;  %s392_s18 = smov [#allocation2]  }
   0x2   :  { %s21_s19 = sshll.u32 %s392_s18, 4  ;;  %s22_s19 = int_to_ptr.vmem [resolvable:$true] %s21_s19 }
   0x3   :  { %s356_s20 = scalar_lea.vmem %s22_s19, 2048  ;;  %p361_p1 = scmp.lt.s32.totalorder %s22_s19, %s22_s19 }
   0x4   :  { %p357_p0 = scmp.ne.s32.totalorder %s22_s19, %s356_s20  ;;  %p362_p2 = scmp.lt.s32.totalorder %s356_s20, %s356_s20 }
   0x6   :  { %p363_p3 = por %p362_p2, %p361_p1 }
   0x8   :  { %p364_p4 = pnand %p363_p3, %p357_p0 }
   0xa   :  { %367 = shalt.err (!%p364_p4)
}
   0xb   :  { %s393_s21 = smov 128   ;;  %s394_s22 = smov 8  }
   0xc   :  { %27 = dma.hbm_to_vmem [thread:$0]  %s482_s2, 2048, %s22_s19, [#allocation3], %s393_s21, %s393_s21, %s394_s22  }
   0xd   :  { %s395_s25 = smov [#allocation4]  }
   0xe   :  { %s33_s26 = sshll.u32 %s395_s25, 4  ;;  %s34_s26 = int_to_ptr.vmem [resolvable:$true] %s33_s26 }
   0xf   :  { %s376_s27 = scalar_lea.vmem %s34_s26, 2048  ;;  %p381_p6 = scmp.lt.s32.totalorder %s34_s26, %s34_s26 }
  0x10   :  { %p377_p5 = scmp.ne.s32.totalorder %s34_s26, %s376_s27  ;;  %p382_p7 = scmp.lt.s32.totalorder %s376_s27, %s376_s27 }
  0x12   :  { %p383_p8 = por %p382_p7, %p381_p6 }
  0x14   :  { %p384_p9 = pnand %p383_p8, %p377_p5 }
  0x16   :  { %387 = shalt.err (!%p384_p9)
}
  0x17   :  { %39 = dma.hbm_to_vmem [thread:$0]  %s483_s3, 2048, %s34_s26, [#allocation5], %s393_s21, %s393_s21, %s394_s22  }
  0x18   :  { %388 = dma.done.wait [#allocation3], 2048  }
  0x19   :  { %389 = vsyncadd [#allocation3], 4294965248 }
  0x1a   :  { %390 = dma.done.wait [#allocation5], 2048  }
  0x1b   :  { %391 = vsyncadd [#allocation5], 4294965248  ;;  %v396_v0 = vmov 0.0   ;;  %vm397_vm0 = vmmov 0   ;;  %v81_v1 = vld [vmem:[#allocation4 + $0x78] sm:$0xff]  ;;  %v80_v3 = vld [vmem:[#allocation4 + $0x70] sm:$0xff] }
  0x1c   :  { %272 = vmatprep.subr.mxu0 %v396_v0  ;;  %307 = vmatprep.subr.mxu1 %v396_v0  ;;  %v64_v2 = vld [vmem:[#allocation2 + $0x78] sm:$0xff]  ;;  %v63_v4 = vld [vmem:[#allocation2 + $0x70] sm:$0xff]  ;;  %v79_v5 = vld [vmem:[#allocation4 + $0x68] sm:$0xff] }
  0x1d   :  { %304 = vmatprep.mubr.msk.f32.mxu0 %vm397_vm0, %v396_v0  ;;  %339 = vmatprep.mubr.msk.f32.mxu1 %vm397_vm0, %v396_v0  ;;  %v62_v6 = vld [vmem:[#allocation2 + $0x68] sm:$0xff]  ;;  %v78_v7 = vld [vmem:[#allocation4 + $0x60] sm:$0xff]  ;;  %v77_v9 = vld [vmem:[#allocation4 + $0x58] sm:$0xff] }
  0x1e   :  { %273 = vmatpush3.msra.mxu0 %v81_v1  ;;  %308 = vmatpush3.msra.mxu1 %v64_v2  ;;  %v61_v8 = vld [vmem:[#allocation2 + $0x60] sm:$0xff]  ;;  %v60_v10 = vld [vmem:[#allocation2 + $0x58] sm:$0xff]  ;;  %v76_v11 = vld [vmem:[#allocation4 + $0x50] sm:$0xff] }
  0x1f   :  { %274 = vmatprep.subr.mxu0 %v396_v0  ;;  %309 = vmatprep.subr.mxu1 %v396_v0  ;;  %v59_v12 = vld [vmem:[#allocation2 + $0x50] sm:$0xff]  ;;  %v75_v13 = vld [vmem:[#allocation4 + $0x48] sm:$0xff]  ;;  %v74_v15 = vld [vmem:[#allocation4 + $0x40] sm:$0xff] }
  0x20   :  { %275 = vmatpush3.msra.mxu0 %v80_v3  ;;  %310 = vmatpush3.msra.mxu1 %v63_v4  ;;  %v58_v14 = vld [vmem:[#allocation2 + $0x48] sm:$0xff]  ;;  %v57_v16 = vld [vmem:[#allocation2 + $0x40] sm:$0xff]  ;;  %v73_v17 = vld [vmem:[#allocation4 + $0x38] sm:$0xff] }
  0x21   :  { %276 = vmatprep.subr.mxu0 %v396_v0  ;;  %311 = vmatprep.subr.mxu1 %v396_v0  ;;  %v56_v18 = vld [vmem:[#allocation2 + $0x38] sm:$0xff]  ;;  %v72_v19 = vld [vmem:[#allocation4 + $0x30] sm:$0xff]  ;;  %v71_v21 = vld [vmem:[#allocation4 + $0x28] sm:$0xff] }
  0x22   :  { %277 = vmatpush3.msra.mxu0 %v79_v5  ;;  %312 = vmatpush3.msra.mxu1 %v62_v6  ;;  %v55_v20 = vld [vmem:[#allocation2 + $0x30] sm:$0xff]  ;;  %v54_v22 = vld [vmem:[#allocation2 + $0x28] sm:$0xff]  ;;  %v70_v23 = vld [vmem:[#allocation4 + $0x20] sm:$0xff] }
  0x23   :  { %278 = vmatprep.subr.mxu0 %v396_v0  ;;  %313 = vmatprep.subr.mxu1 %v396_v0  ;;  %v53_v24 = vld [vmem:[#allocation2 + $0x20] sm:$0xff]  ;;  %v69_v25 = vld [vmem:[#allocation4 + $0x18] sm:$0xff]  ;;  %v68_v27 = vld [vmem:[#allocation4 + $0x10] sm:$0xff] }
  0x24   :  { %279 = vmatpush3.msra.mxu0 %v78_v7  ;;  %314 = vmatpush3.msra.mxu1 %v61_v8  ;;  %v52_v26 = vld [vmem:[#allocation2 + $0x18] sm:$0xff]  ;;  %v51_v28 = vld [vmem:[#allocation2 + $0x10] sm:$0xff]  ;;  %v67_v29 = vld [vmem:[#allocation4 + $0x8] sm:$0xff] }
  0x25   :  { %280 = vmatprep.subr.mxu0 %v396_v0  ;;  %315 = vmatprep.subr.mxu1 %v396_v0  ;;  %v50_v30 = vld [vmem:[#allocation2 + $0x8] sm:$0xff]  ;;  %v66_v31 = vld [vmem:[#allocation4] sm:$0xff] }
  0x26   :  { %281 = vmatpush3.msra.mxu0 %v77_v9  ;;  %316 = vmatpush3.msra.mxu1 %v60_v10  ;;  %v49_v32 = vld [vmem:[#allocation2] sm:$0xff] }
  0x27   :  { %282 = vmatprep.subr.mxu0 %v396_v0  ;;  %317 = vmatprep.subr.mxu1 %v396_v0  ;;  %v65_v33 = vld [vmem:[%s481_s1] sm:$0xff] }
  0x28   :  { %283 = vmatpush3.msra.mxu0 %v76_v11  ;;  %318 = vmatpush3.msra.mxu1 %v59_v12  ;;  %v48_v34 = vld [vmem:[%s480_s0] sm:$0xff] }
  0x29   :  { %284 = vmatprep.subr.mxu0 %v396_v0  ;;  %319 = vmatprep.subr.mxu1 %v396_v0  ;;  %v237_v37 = vld [vmem:[%s484_s4] ss:$0 sm:$0xff] }
  0x2a   :  { %285 = vmatpush3.msra.mxu0 %v75_v13  ;;  %320 = vmatpush3.msra.mxu1 %v58_v14 }
  0x2b   :  { %286 = vmatprep.subr.mxu0 %v396_v0  ;;  %321 = vmatprep.subr.mxu1 %v396_v0 }
  0x2c   :  { %287 = vmatpush3.msra.mxu0 %v74_v15  ;;  %322 = vmatpush3.msra.mxu1 %v57_v16 }
  0x2d   :  { %288 = vmatprep.subr.mxu0 %v396_v0  ;;  %323 = vmatprep.subr.mxu1 %v396_v0 }
  0x2e   :  { %289 = vmatpush3.msra.mxu0 %v73_v17  ;;  %324 = vmatpush3.msra.mxu1 %v56_v18 }
  0x2f   :  { %290 = vmatprep.subr.mxu0 %v396_v0  ;;  %325 = vmatprep.subr.mxu1 %v396_v0 }
  0x30   :  { %291 = vmatpush3.msra.mxu0 %v72_v19  ;;  %326 = vmatpush3.msra.mxu1 %v55_v20 }
  0x31   :  { %292 = vmatprep.subr.mxu0 %v396_v0  ;;  %327 = vmatprep.subr.mxu1 %v396_v0 }
  0x32   :  { %293 = vmatpush3.msra.mxu0 %v71_v21  ;;  %328 = vmatpush3.msra.mxu1 %v54_v22 }
  0x33   :  { %294 = vmatprep.subr.mxu0 %v396_v0  ;;  %329 = vmatprep.subr.mxu1 %v396_v0 }
  0x34   :  { %295 = vmatpush3.msra.mxu0 %v70_v23  ;;  %330 = vmatpush3.msra.mxu1 %v53_v24 }
  0x35   :  { %296 = vmatprep.subr.mxu0 %v396_v0  ;;  %331 = vmatprep.subr.mxu1 %v396_v0 }
  0x36   :  { %297 = vmatpush3.msra.mxu0 %v69_v25  ;;  %332 = vmatpush3.msra.mxu1 %v52_v26 }
  0x37   :  { %298 = vmatprep.subr.mxu0 %v396_v0  ;;  %333 = vmatprep.subr.mxu1 %v396_v0 }
  0x38   :  { %299 = vmatpush3.msra.mxu0 %v68_v27  ;;  %334 = vmatpush3.msra.mxu1 %v51_v28 }
  0x39   :  { %300 = vmatprep.subr.mxu0 %v396_v0  ;;  %335 = vmatprep.subr.mxu1 %v396_v0 }
  0x3a   :  { %301 = vmatpush3.msra.mxu0 %v67_v29  ;;  %336 = vmatpush3.msra.mxu1 %v50_v30 }
  0x3b   :  { %302 = vmatprep.subr.mxu0 %v396_v0  ;;  %337 = vmatprep.subr.mxu1 %v396_v0 }
  0x3c   :  { %303 = vmatpush3.msra.mxu0 %v66_v31  ;;  %338 = vmatpush3.msra.mxu1 %v49_v32 }
  0x3d   :  { %305 = vmatmul.mubr.f32.vlgmr.msra.gmra.mxu0 %v65_v33  ;;  %340 = vmatmul.mubr.f32.vlgmr.msra.gmra.mxu1 %v48_v34 }
  0xfd   :  { %v148_v35 = vpop.f32.mrf.mxu0  ;;  %v218_v36 = vpop.f32.mrf.mxu1 }
  0xfe   :  { %v219_v38 = vadd.f32 %v218_v36, %v148_v35 }
  0xff   :  { %v306_v39 = vpop.f32.mrf.mxu0  ;;  %v341_v40 = vpop.f32.mrf.mxu1 }
 0x100   :  { %v229_v41 = vadd.f32 %v237_v37, %v219_v38 }
 0x102   :  { %230 = vst [vmem:[%s485_s5] sm:$0xff] %v229_v41 }
 0x103   :  { %235 = vsyncpa [#allocation3], 1 }
 0x104   :  { %236 = vsyncpa [#allocation5], 1 }

</bundles_post_ra>
